<compile_context>
chip_gen: v5e
topology: v5e:2x2
jax: 0.10.0
libtpu: 0.0.40
codegen_flags: <defaults>
</compile_context>

<pallas_src>
import functools

import jax
import jax.numpy as jnp
from jax.experimental import pallas as pl
from jax.experimental.pallas import tpu as pltpu


def _cdiv(a, b):
    return (a + b - 1) // b


def _round_up(n, m):
    return _cdiv(n, m) * m


# --------------------------------------------------------------------------- #
# Kernel
# --------------------------------------------------------------------------- #
def _mlp_kernel(n_layers, last_activation, matmul_dtype, elementwise_dtype,
                *refs):
    """Fused MLP forward on one (tb, Kp0) batch tile.

    refs = (x_ref, w_0..w_{L-1}, b_0..b_{L-1}, o_ref)
      x_ref : (tb, Kp0)      activations tile, already in matmul_dtype
      w_i   : (Kp_i, Np_i)   zero-padded weight (matmul_dtype), resident
      b_i   : (1,  Np_i)     zero-padded bias (f32), resident
      o_ref : (tb, Np_last)  output tile
    """
    x_ref = refs[0]
    w_refs = refs[1:1 + n_layers]
    b_refs = refs[1 + n_layers:1 + 2 * n_layers]
    o_ref = refs[1 + 2 * n_layers]

    h = x_ref[...]  # matmul_dtype straight into the MXU
    for i in range(n_layers):
        acc = jnp.dot(h, w_refs[i][...], preferred_element_type=jnp.float32)
        h = acc.astype(elementwise_dtype) + b_refs[i][...].astype(elementwise_dtype)
        if i < n_layers - 1:
            h = jnp.maximum(h, 0).astype(matmul_dtype)  # ReLU on hidden layers
    if last_activation is not None:
        # Applied on the zero-padded slab; valid for element-wise activations
        # (tanh / sigmoid / relu) — padded lanes are sliced off by the wrapper.
        # TODO(synk): non-elementwise last activations (e.g. softmax) would
        # need the padded lanes masked before activation.
        h = last_activation(h)
    o_ref[...] = h.astype(o_ref.dtype)


# --------------------------------------------------------------------------- #
# One-time parameter packing (hoisted out of the per-call forward path)
# --------------------------------------------------------------------------- #
def pack_net_params(weights, biases, matmul_dtype=jnp.bfloat16):
    """Pad each layer's params to 128-lane multiples once, at init time.

    weights: list of (in_i, out_i) arrays (transposed PyTorch weight)
    biases:  list of (out_i,) arrays
    Returns (w_padded tuple, b_padded tuple, dims tuple).
    """
    LANE = 128
    dims = tuple([weights[0].shape[0]] + [w.shape[1] for w in weights])
    w_padded, b_padded = [], []
    for w, b in zip(weights, biases):
        kp = _round_up(w.shape[0], LANE)
        np_ = _round_up(w.shape[1], LANE)
        wp = jnp.zeros((kp, np_), matmul_dtype).at[:w.shape[0], :w.shape[1]].set(
            w.astype(matmul_dtype))
        bp = jnp.zeros((1, np_), jnp.float32).at[0, :b.shape[0]].set(
            b.astype(jnp.float32))
        w_padded.append(wp)
        b_padded.append(bp)
    return tuple(w_padded), tuple(b_padded), dims


# --------------------------------------------------------------------------- #
# Forward pass
# --------------------------------------------------------------------------- #
@functools.partial(
    jax.jit,
    static_argnames=("dims", "last_activation", "matmul_dtype",
                     "elementwise_dtype", "out_dtype", "block_batch"))
def net_forward(x, w_padded, b_padded, *, dims, last_activation=None,
                matmul_dtype=jnp.bfloat16, elementwise_dtype=jnp.float32,
                out_dtype=jnp.float32, block_batch=512):
    """Run the whole MLP in a single fused Pallas kernel.

    x:        (batch, in_dim)
    w_padded: tuple of pre-padded (Kp_i, Np_i) weights (from pack_net_params)
    b_padded: tuple of pre-padded (1, Np_i) biases
    dims:     logical layer dims tuple (in_dim, d1, ..., out_dim)
    """
    n_layers = len(w_padded)
    batch, in_dim = x.shape
    assert in_dim == dims[0], (in_dim, dims)
    kp0 = w_padded[0].shape[0]
    np_last = w_padded[-1].shape[1]
    SUBLANE = 8

    # --- batch tiling: balanced tiles, >=2 grid steps when possible (v7x) ---
    num_tiles = _cdiv(batch, block_batch)
    num_tiles = max(num_tiles, min(2, max(1, batch // SUBLANE)))
    tb = _round_up(_cdiv(batch, num_tiles), SUBLANE)
    grid_n = _cdiv(batch, tb)
    bp = grid_n * tb

    # Zero feature/batch padding is exact: padded input columns hit zero weight
    # rows, padded output columns get zero weights + zero bias, relu(0)=0.
    x_pad = jnp.zeros((bp, kp0), matmul_dtype).at[:batch, :in_dim].set(
        x.astype(matmul_dtype))

    kernel = functools.partial(_mlp_kernel, n_layers, last_activation,
                               matmul_dtype, elementwise_dtype)

    # --- VMEM budget: resident params (x2 buffers) + activation/output tiles ---
    itemsize_m = jnp.dtype(matmul_dtype).itemsize
    itemsize_o = jnp.dtype(out_dtype).itemsize
    w_bytes = sum(int(w.size) * itemsize_m for w in w_padded)
    b_bytes = sum(int(b.size) * 4 for b in b_padded)
    max_np = max(w.shape[1] for w in w_padded)
    act_bytes = tb * kp0 * itemsize_m + tb * np_last * itemsize_o
    scratch_bytes = 2 * tb * max_np * 4
    needed = 2 * (w_bytes + b_bytes + act_bytes) + scratch_bytes
    vmem_limit = int(min(48 * 2**20, max(4 * 2**20, 2 * needed)))
    # TODO(synk): for very wide layers (> ~24 MiB of weights) tile the layer /
    # feature dims instead of keeping the whole stack resident (v7x 64 MiB VMEM).

    # --- cost estimate (advisory) ---
    flops = 2 * bp * sum(int(w.shape[0]) * int(w.shape[1]) for w in w_padded)
    transcendentals = bp * np_last if last_activation is not None else 0
    bytes_accessed = int(x_pad.size * itemsize_m + w_bytes + b_bytes
                         + bp * np_last * itemsize_o)

    in_specs = [pl.BlockSpec((tb, kp0), lambda b: (b, 0))]
    # weights / biases: full-extent blocks, constant index_map -> stay resident
    for w in w_padded:
        in_specs.append(pl.BlockSpec(w.shape, lambda b: (0, 0)))
    for b_ in b_padded:
        in_specs.append(pl.BlockSpec(b_.shape, lambda b: (0, 0)))

    out_pad = pl.pallas_call(
        kernel,
        out_shape=jax.ShapeDtypeStruct((bp, np_last), out_dtype),
        grid=(grid_n,),
        in_specs=in_specs,
        out_specs=pl.BlockSpec((tb, np_last), lambda b: (b, 0)),
        compiler_params=pltpu.CompilerParams(
            dimension_semantics=("parallel",),   # batch tiles are independent
            vmem_limit_bytes=vmem_limit),
        cost_estimate=pl.CostEstimate(flops=flops,
                                      transcendentals=transcendentals,
                                      bytes_accessed=bytes_accessed),
    )(x_pad, *w_padded, *b_padded)

    # Slice the lane/batch padding away.
    return out_pad[:batch, :dims[-1]]


# --------------------------------------------------------------------------- #
# Init / reference
# --------------------------------------------------------------------------- #
def init_net_params(key, in_dim, out_dim, layer_dims, init_bound):
    """Synthetic init mirroring Net._init_weights (xavier-uniform-like hidden
    weights, uniform(-bound, bound) last weight, PyTorch-default biases).
    Weights are returned in (in, out) layout (transposed PyTorch weight)."""
    dims = [in_dim] + list(layer_dims) + [out_dim]
    weights, biases = [], []
    n_layers = len(dims) - 1
    for i in range(n_layers):
        fan_in, fan_out = dims[i], dims[i + 1]
        key, kw, kb = jax.random.split(key, 3)
        if i < n_layers - 1:
            limit = (6.0 / (fan_in + fan_out)) ** 0.5
        else:
            limit = init_bound
        w = jax.random.uniform(kw, (fan_in, fan_out), jnp.float32, -limit, limit)
        b_limit = 1.0 / (fan_in ** 0.5)
        b = jax.random.uniform(kb, (fan_out,), jnp.float32, -b_limit, b_limit)
        weights.append(w)
        biases.append(b)
    return weights, biases


def reference_forward(x, weights, biases, last_activation=None):
    """Pure-JAX f32 reference matching the PyTorch forward semantics."""
    h = x
    for w, b in zip(weights[:-1], biases[:-1]):
        h = jnp.maximum(h @ w + b, 0.0)
    h = h @ weights[-1] + biases[-1]
    if last_activation is not None:
        h = last_activation(h)
    return h


if __name__ == "__main__":
    in_dim = 32
    layer_dims = [64, 64]
    out_dim = 16
    init_bound = 3e-3
    last_activation = jnp.tanh  # e.g. a tanh-squashed policy head

    key = jax.random.PRNGKey(0)
    key, kx1, kx2 = jax.random.split(key, 3)
    weights, biases = init_net_params(key, in_dim, out_dim, layer_dims,
                                      init_bound)

    # One-time packing (hoisted out of the per-call forward path).
    w_p, b_p, dims = pack_net_params(weights, biases, matmul_dtype=jnp.bfloat16)

    # Case 1: tiny batch (single grid step).
    x_small = jax.random.normal(kx1, (8, in_dim), jnp.float32)
    out_small = jax.block_until_ready(
        net_forward(x_small, w_p, b_p, dims=dims,
                    last_activation=last_activation))
    ref_small = reference_forward(x_small, weights, biases,
                                  last_activation=last_activation)
    assert out_small.shape == (8, out_dim), out_small.shape
    # bf16 matmuls vs f32 reference -> loose tolerance.
    assert jnp.allclose(out_small, ref_small, atol=2e-2, rtol=2e-2), \
        "mismatch vs reference (small batch)"

    # Case 2: batch large enough to exercise balanced batch tiling (grid of 2).
    x_big = jax.random.normal(kx2, (300, in_dim), jnp.float32)
    out_big = jax.block_until_ready(
        net_forward(x_big, w_p, b_p, dims=dims,
                    last_activation=last_activation))
    ref_big = reference_forward(x_big, weights, biases,
                                last_activation=last_activation)
    assert out_big.shape == (300, out_dim), out_big.shape
    assert jnp.allclose(out_big, ref_big, atol=2e-2, rtol=2e-2), \
        "mismatch vs reference (large batch)"

    print("KERNEL_OK")
</pallas_src>

<mosaic_0001>
module attributes {stable_mosaic.version = 11 : i64} {
  func.func @_mlp_kernel(%arg0: i32, %arg1: memref<8x128xbf16, #tpu.memory_space<vmem>>, %arg2: memref<128x128xbf16, #tpu.memory_space<vmem>>, %arg3: memref<128x128xbf16, #tpu.memory_space<vmem>>, %arg4: memref<128x128xbf16, #tpu.memory_space<vmem>>, %arg5: memref<1x128xf32, #tpu.memory_space<vmem>>, %arg6: memref<1x128xf32, #tpu.memory_space<vmem>>, %arg7: memref<1x128xf32, #tpu.memory_space<vmem>>, %arg8: memref<8x128xf32, #tpu.memory_space<vmem>>) attributes {dimension_semantics = [#tpu.dimension_semantics<parallel>], iteration_bounds = array<i64: 1>, scalar_prefetch = 0 : i64, scratch_operands = 0 : i64, tpu.core_type = #tpu.core_type<tc>, window_params = [{transform_indices = @transform_0, window_bounds = array<i64: 8, 128>}, {pipeline_mode = #tpu.pipeline_mode<synchronous>, transform_indices = @transform_1, window_bounds = array<i64: 128, 128>}, {pipeline_mode = #tpu.pipeline_mode<synchronous>, transform_indices = @transform_2, window_bounds = array<i64: 128, 128>}, {pipeline_mode = #tpu.pipeline_mode<synchronous>, transform_indices = @transform_3, window_bounds = array<i64: 128, 128>}, {pipeline_mode = #tpu.pipeline_mode<synchronous>, transform_indices = @transform_4, window_bounds = array<i64: 1, 128>}, {pipeline_mode = #tpu.pipeline_mode<synchronous>, transform_indices = @transform_5, window_bounds = array<i64: 1, 128>}, {pipeline_mode = #tpu.pipeline_mode<synchronous>, transform_indices = @transform_6, window_bounds = array<i64: 1, 128>}, {transform_indices = @transform_7, window_bounds = array<i64: 8, 128>}]} {
    %c0 = arith.constant 0 : index
    %c0_0 = arith.constant 0 : index
    %0 = vector.load %arg1[%c0, %c0_0] : memref<8x128xbf16, #tpu.memory_space<vmem>>, vector<8x128xbf16>
    %c0_1 = arith.constant 0 : index
    %c0_2 = arith.constant 0 : index
    %1 = vector.load %arg2[%c0_1, %c0_2] : memref<128x128xbf16, #tpu.memory_space<vmem>>, vector<128x128xbf16>
    %cst = arith.constant dense<0.000000e+00> : vector<8x128xf32>
    %2 = tpu.matmul %0, %1, %cst {dimension_numbers = #tpu.dot_dimension_numbers<[1], [0], [0], [1], [0, 0, 1, 1], [], []>} : vector<8x128xbf16>, vector<128x128xbf16>, vector<8x128xf32> -> vector<8x128xf32>
    %c0_3 = arith.constant 0 : index
    %c0_4 = arith.constant 0 : index
    %3 = vector.load %arg5[%c0_3, %c0_4] : memref<1x128xf32, #tpu.memory_space<vmem>>, vector<1x128xf32>
    %4 = vector.broadcast %3 : vector<1x128xf32> to vector<8x128xf32>
    %5 = arith.addf %2, %4 : vector<8x128xf32>
    %cst_5 = arith.constant 0.000000e+00 : f32
    %6 = vector.broadcast %cst_5 : f32 to vector<8x128xf32>
    %7 = arith.maximumf %5, %6 : vector<8x128xf32>
    %8 = arith.truncf %7 : vector<8x128xf32> to vector<8x128xbf16>
    %c0_6 = arith.constant 0 : index
    %c0_7 = arith.constant 0 : index
    %9 = vector.load %arg3[%c0_6, %c0_7] : memref<128x128xbf16, #tpu.memory_space<vmem>>, vector<128x128xbf16>
    %cst_8 = arith.constant dense<0.000000e+00> : vector<8x128xf32>
    %10 = tpu.matmul %8, %9, %cst_8 {dimension_numbers = #tpu.dot_dimension_numbers<[1], [0], [0], [1], [0, 0, 1, 1], [], []>} : vector<8x128xbf16>, vector<128x128xbf16>, vector<8x128xf32> -> vector<8x128xf32>
    %c0_9 = arith.constant 0 : index
    %c0_10 = arith.constant 0 : index
    %11 = vector.load %arg6[%c0_9, %c0_10] : memref<1x128xf32, #tpu.memory_space<vmem>>, vector<1x128xf32>
    %12 = vector.broadcast %11 : vector<1x128xf32> to vector<8x128xf32>
    %13 = arith.addf %10, %12 : vector<8x128xf32>
    %cst_11 = arith.constant 0.000000e+00 : f32
    %14 = vector.broadcast %cst_11 : f32 to vector<8x128xf32>
    %15 = arith.maximumf %13, %14 : vector<8x128xf32>
    %16 = arith.truncf %15 : vector<8x128xf32> to vector<8x128xbf16>
    %c0_12 = arith.constant 0 : index
    %c0_13 = arith.constant 0 : index
    %17 = vector.load %arg4[%c0_12, %c0_13] : memref<128x128xbf16, #tpu.memory_space<vmem>>, vector<128x128xbf16>
    %cst_14 = arith.constant dense<0.000000e+00> : vector<8x128xf32>
    %18 = tpu.matmul %16, %17, %cst_14 {dimension_numbers = #tpu.dot_dimension_numbers<[1], [0], [0], [1], [0, 0, 1, 1], [], []>} : vector<8x128xbf16>, vector<128x128xbf16>, vector<8x128xf32> -> vector<8x128xf32>
    %c0_15 = arith.constant 0 : index
    %c0_16 = arith.constant 0 : index
    %19 = vector.load %arg7[%c0_15, %c0_16] : memref<1x128xf32, #tpu.memory_space<vmem>>, vector<1x128xf32>
    %20 = vector.broadcast %19 : vector<1x128xf32> to vector<8x128xf32>
    %21 = arith.addf %18, %20 : vector<8x128xf32>
    %22 = math.tanh %21 : vector<8x128xf32>
    %c0_17 = arith.constant 0 : index
    %c0_18 = arith.constant 0 : index
    %23 = vector.load %arg8[%c0_17, %c0_18] : memref<8x128xf32, #tpu.memory_space<vmem>>, vector<8x128xf32>
    tpu.vector_store %arg8[%c0_17, %c0_18], %22 {strides = array<i32>} : memref<8x128xf32, #tpu.memory_space<vmem>>, vector<8x128xf32>,
    return
  }
  func.func @transform_0(%arg0: i32) -> (i32, i32) {
    %c0_i32 = arith.constant 0 : i32
    %c0_i32_0 = arith.constant 0 : i32
    return %arg0, %c0_i32 : i32, i32
  }
  func.func @transform_1(%arg0: i32) -> (i32, i32) {
    %c0_i32 = arith.constant 0 : i32
    %c0_i32_0 = arith.constant 0 : i32
    %c0_i32_1 = arith.constant 0 : i32
    return %c0_i32, %c0_i32_0 : i32, i32
  }
  func.func @transform_2(%arg0: i32) -> (i32, i32) {
    %c0_i32 = arith.constant 0 : i32
    %c0_i32_0 = arith.constant 0 : i32
    %c0_i32_1 = arith.constant 0 : i32
    return %c0_i32, %c0_i32_0 : i32, i32
  }
  func.func @transform_3(%arg0: i32) -> (i32, i32) {
    %c0_i32 = arith.constant 0 : i32
    %c0_i32_0 = arith.constant 0 : i32
    %c0_i32_1 = arith.constant 0 : i32
    return %c0_i32, %c0_i32_0 : i32, i32
  }
  func.func @transform_4(%arg0: i32) -> (i32, i32) {
    %c0_i32 = arith.constant 0 : i32
    %c0_i32_0 = arith.constant 0 : i32
    %c0_i32_1 = arith.constant 0 : i32
    return %c0_i32, %c0_i32_0 : i32, i32
  }
  func.func @transform_5(%arg0: i32) -> (i32, i32) {
    %c0_i32 = arith.constant 0 : i32
    %c0_i32_0 = arith.constant 0 : i32
    %c0_i32_1 = arith.constant 0 : i32
    return %c0_i32, %c0_i32_0 : i32, i32
  }
  func.func @transform_6(%arg0: i32) -> (i32, i32) {
    %c0_i32 = arith.constant 0 : i32
    %c0_i32_0 = arith.constant 0 : i32
    %c0_i32_1 = arith.constant 0 : i32
    return %c0_i32, %c0_i32_0 : i32, i32
  }
  func.func @transform_7(%arg0: i32) -> (i32, i32) {
    %c0_i32 = arith.constant 0 : i32
    %c0_i32_0 = arith.constant 0 : i32
    return %arg0, %c0_i32 : i32, i32
  }
}

</mosaic_0001>

<bundles_post_ra>
// kernel: net_forward.1
= control target key start
LH: loop header
LB: loop body
LE: loop exit
PB: predicated region body
PF: predicated region fallthrough
CT: control target
= control target key end

     0   :  { %12 = vsyncpa [#allocation3], 0  ;;  %s645_s0 = inlined_call_operand.vmem [shape: bf16[8,128], index: 0, kind: input, shape index: {}]   ;;  %s646_s1 = inlined_call_operand.hbm [shape: bf16[128,128], index: 1, kind: input, shape index: {}]   ;;  %s647_s2 = inlined_call_operand.hbm [shape: bf16[128,128], index: 2, kind: input, shape index: {}]   ;;  %s648_s3 = inlined_call_operand.hbm [shape: bf16[128,128], index: 3, kind: input, shape index: {}]   ;;  %s649_s4 = inlined_call_operand.vmem [shape: f32[1,128], index: 4, kind: input, shape index: {}]   ;;  %s650_s5 = inlined_call_operand.vmem [shape: f32[1,128], index: 5, kind: input, shape index: {}]   ;;  %s651_s6 = inlined_call_operand.vmem [shape: f32[1,128], index: 6, kind: input, shape index: {}]   ;;  %s652_s7 = inlined_call_operand.hbm [shape: f32[8,128], index: 7, kind: output, shape index: {}]  }
   0x1   :  { %13 = vsyncpa [#allocation6], 0 }
   0x2   :  { %14 = vsyncpa [#allocation4], 0  ;;  %s34_s26 = sshll.u32 %s647_s2, 4  ;;  %s575_s27 = smov [#allocation5]   ;;  %s35_s26 = int_to_ptr.hbm [resolvable:$true] %s34_s26 }
   0x3   :  { %s36_s28 = sshll.u32 %s575_s27, 4  ;;  %s21_s8 = sshll.u32 %s646_s1, 4  ;;  %s37_s28 = int_to_ptr.vmem [resolvable:$true] %s36_s28  ;;  %s22_s8 = int_to_ptr.hbm [resolvable:$true] %s21_s8 }
   0x4   :  { %s576_s9 = smov 64   ;;  %s577_s10 = smov 4  }
   0x5   :  { %42 = dma.hbm_to_vmem [thread:$0]  %s35_s26, 1024, %s37_s28, [#allocation6], %s576_s9, %s576_s9, %s577_s10  }
   0x6   :  { %s578_s11 = smov [#allocation2]   ;;  %s47_s15 = sshll.u32 %s648_s3, 4  ;;  %s48_s15 = int_to_ptr.hbm [resolvable:$true] %s47_s15 }
   0x7   :  { %s23_s12 = sshll.u32 %s578_s11, 4  ;;  %s579_s2 = smov [#allocation7]   ;;  %s24_s12 = int_to_ptr.vmem [resolvable:$true] %s23_s12 }
   0x8   :  { %29 = dma.hbm_to_vmem [thread:$0]  %s22_s8, 1024, %s24_s12, [#allocation3], %s576_s9, %s576_s9, %s577_s10  }
   0x9   :  { %s49_s16 = sshll.u32 %s579_s2, 4  ;;  %s50_s16 = int_to_ptr.vmem [resolvable:$true] %s49_s16 }
   0xa   :  { %55 = dma.hbm_to_vmem [thread:$0]  %s48_s15, 1024, %s50_s16, [#allocation6], %s576_s9, %s576_s9, %s577_s10  }
   0xb   :  { %569 = dma.done.wait [#allocation3], 1024  }
   0xc   :  { %570 = vsyncadd [#allocation3], 4294966272 }
   0xd   :  { %571 = dma.done.wait [#allocation6], 2048  }
   0xe   :  { %572 = vsyncadd [#allocation6], 4294965248  ;;  %v445_v0 = vld [vmem:[#allocation2 + $0x38] sm:$0xff]  ;;  %v444_v1 = vld [vmem:[#allocation2 + $0x30] sm:$0xff]  ;;  %s580_s21 = smov [#allocation8]   ;;  %s331_s25 = sshll.u32 %s652_s7, 4  ;;  %s332_s25 = int_to_ptr.hbm [resolvable:$true] %s331_s25 }
   0xf   :  { %143 = vmatpush.bf16.msra.mxu0 %v445_v0  ;;  %v453_v2 = vld [vmem:[#allocation5 + $0x38] sm:$0xff]  ;;  %v452_v3 = vld [vmem:[#allocation5 + $0x30] sm:$0xff]  ;;  %v443_v4 = vld [vmem:[#allocation2 + $0x28] sm:$0xff]  ;;  %s329_s22 = sshll.u32 %s580_s21, 4  ;;  %s330_s22 = int_to_ptr.vmem [resolvable:$true] %s329_s22 }
  0x10   :  { %226 = vmatpush.bf16.msra.mxu1 %v453_v2  ;;  %v451_v5 = vld [vmem:[#allocation5 + $0x28] sm:$0xff]  ;;  %v442_v6 = vld [vmem:[#allocation2 + $0x20] sm:$0xff]  ;;  %v441_v8 = vld [vmem:[#allocation2 + $0x18] sm:$0xff] }
  0x11   :  { %v450_v7 = vld [vmem:[#allocation5 + $0x20] sm:$0xff]  ;;  %v449_v9 = vld [vmem:[#allocation5 + $0x18] sm:$0xff]  ;;  %v440_v10 = vld [vmem:[#allocation2 + $0x10] sm:$0xff] }
  0x12   :  { %v448_v11 = vld [vmem:[#allocation5 + $0x10] sm:$0xff]  ;;  %v439_v12 = vld [vmem:[#allocation2 + $0x8] sm:$0xff]  ;;  %v438_v13 = vld [vmem:[#allocation2] sm:$0xff] }
  0x13   :  { %144 = vmatpush.bf16.msra.mxu0 %v444_v1  ;;  %v74_v14 = vld [vmem:[%s645_s0] sm:$0xf]  ;;  %v447_v15 = vld [vmem:[#allocation5 + $0x8] sm:$0xff]  ;;  %v461_v17 = vld [vmem:[#allocation7 + $0x38] sm:$0xff] }
  0x14   :  { %227 = vmatpush.bf16.msra.mxu1 %v452_v3  ;;  %v446_v16 = vld [vmem:[#allocation5] sm:$0xff]  ;;  %309 = vmatpush.bf16.msra.mxu2 %v461_v17  ;;  %v460_v18 = vld [vmem:[#allocation7 + $0x30] sm:$0xff]  ;;  %v459_v19 = vld [vmem:[#allocation7 + $0x28] sm:$0xff] }
  0x15   :  { %v458_v20 = vld [vmem:[#allocation7 + $0x20] sm:$0xff]  ;;  %v457_v21 = vld [vmem:[#allocation7 + $0x18] sm:$0xff]  ;;  %v456_v22 = vld [vmem:[#allocation7 + $0x10] sm:$0xff] }
  0x16   :  { %v468_v23 = vld [vmem:[%s649_s4] ss:$0 sm:$0xff]  ;;  %v455_v29 = vld [vmem:[#allocation7 + $0x8] sm:$0xff] }
  0x17   :  { %145 = vmatpush.bf16.msra.mxu0 %v443_v4  ;;  %v454_v30 = vld [vmem:[#allocation7] sm:$0xff] }
  0x18   :  { %228 = vmatpush.bf16.msra.mxu1 %v451_v5  ;;  %310 = vmatpush.bf16.msra.mxu2 %v460_v18  ;;  %v469_v31 = vld [vmem:[%s650_s5] ss:$0 sm:$0xff] }
  0x19   :  { %v470_v37 = vld [vmem:[%s651_s6] ss:$0 sm:$0xff] }
  0x1b   :  { %146 = vmatpush.bf16.msra.mxu0 %v442_v6 }
  0x1c   :  { %229 = vmatpush.bf16.msra.mxu1 %v450_v7  ;;  %311 = vmatpush.bf16.msra.mxu2 %v459_v19 }
  0x1f   :  { %147 = vmatpush.bf16.msra.mxu0 %v441_v8 }
  0x20   :  { %230 = vmatpush.bf16.msra.mxu1 %v449_v9  ;;  %312 = vmatpush.bf16.msra.mxu2 %v458_v20 }
  0x23   :  { %148 = vmatpush.bf16.msra.mxu0 %v440_v10 }
  0x24   :  { %231 = vmatpush.bf16.msra.mxu1 %v448_v11  ;;  %313 = vmatpush.bf16.msra.mxu2 %v457_v21 }
  0x27   :  { %149 = vmatpush.bf16.msra.mxu0 %v439_v12 }
  0x28   :  { %232 = vmatpush.bf16.msra.mxu1 %v447_v15  ;;  %314 = vmatpush.bf16.msra.mxu2 %v456_v22 }
  0x2b   :  { %150 = vmatpush.bf16.msra.mxu0 %v438_v13 }
  0x2c   :  { %233 = vmatpush.bf16.msra.mxu1 %v446_v16  ;;  %315 = vmatpush.bf16.msra.mxu2 %v455_v29 }
  0x2e   :  { %151 = vmatmul.bf16.vlgmr.msra.gmra.mxu0 %v74_v14 }
  0x30   :  { %316 = vmatpush.bf16.msra.mxu2 %v454_v30 }
  0xab   :  { %v152_v24 = vpop.f32.mrf.mxu0 }
  0xac   :  { %v153_v25 = vadd.f32 %v468_v23, %v152_v24 }
  0xae   :  { %v156_v26 = vmax.f32 %v153_v25, 0.0 }
  0xb0   :  { %v157_v27 = vpack.c.bf16 %v156_v26, %v156_v26 }
  0xb2   :  { %234 = vmatmul.bf16.vlgmr.msra.gmra.mxu1 %v157_v27 }
  0xb3   :  { %v154_v28 = vpop.f32.mrf.mxu0 }
 0x12f   :  { %v235_v32 = vpop.f32.mrf.mxu1 }
 0x130   :  { %v236_v33 = vadd.f32 %v469_v31, %v235_v32 }
 0x132   :  { %v239_v34 = vmax.f32 %v236_v33, 0.0 }
 0x134   :  { %v240_v35 = vpack.c.bf16 %v239_v34, %v239_v34 }
 0x136   :  { %317 = vmatmul.bf16.vlgmr.msra.gmra.mxu2 %v240_v35 }
 0x137   :  { %v237_v36 = vpop.f32.mrf.mxu1 }
 0x1b9   :  { %v318_v38 = vpop.f32.mrf.mxu2 }
 0x1ba   :  { %v319_v39 = vadd.f32 %v470_v37, %v318_v38 }
 0x1bc   :  { %471 = vtanh.f32 %v319_v39 }
 0x1c1   :  { %v320_v40 = vpop.f32.mrf.mxu2 }
 0x1c2   :  { %v472_v41 = vpop.eup %471 }
 0x1c3   :  { %323 = vst [vmem:[#allocation8] sm:$0xff] %v472_v41 }
 0x1c4   :  { %334 = dma.vmem_to_hbm [thread:$0]  %s330_s22, 128, %s332_s25, [#allocation4]  }
 0x1c5   :  { %573 = dma.done.wait [#allocation4], 128  }
 0x1c6   :  { %574 = vsyncadd [#allocation4], 4294967168 }
 0x1c7   :  { %339 = vsyncpa [#allocation3], 1 }
 0x1c8   :  { %340 = vsyncpa [#allocation6], 1 }
 0x1c9   :  { %341 = vsyncpa [#allocation4], 1 }

</bundles_post_ra>
